<compile_context>
chip_gen: v5e
topology: v5e:2x2
jax: 0.10.0
libtpu: 0.0.40
codegen_flags: <defaults>
</compile_context>

<pallas_src>
import math

import jax
import jax.numpy as jnp
from jax.experimental import pallas as pl
from jax.experimental.pallas import tpu as pltpu


# ---------------------------------------------------------------------------
# One-time parameter preparation (hoisted out of the per-step hot path).
# ---------------------------------------------------------------------------
def prepare_decoder_params(w_ih, w_hh, b_ih, b_hh, context_dim,
                           *, weight_dtype=jnp.bfloat16):
    """Split / reorder LSTMCell parameters once at model-load time.

    Returns:
      w_ctx : (Dc, 4H) weight_dtype — context -> gates
      w_emb : (De, 4H) weight_dtype — word embedding -> gates
      w_h   : (H,  4H) weight_dtype — recurrent h -> gates
      b     : (1,  4H) float32      — b_ih + b_hh
    Gate columns are reordered from PyTorch's [i, f, g, o] to [i, f, o, g] so
    the kernel uses one sigmoid region (3H) and one tanh region (H).
    """
    four_h = w_ih.shape[0]
    H = four_h // 4
    perm = jnp.concatenate([jnp.arange(0, 2 * H),
                            jnp.arange(3 * H, 4 * H),
                            jnp.arange(2 * H, 3 * H)])
    w_ih_p = w_ih[perm]                                           # (4H, Dc+De)
    w_hh_p = w_hh[perm]                                           # (4H, H)
    w_ctx = jnp.transpose(w_ih_p[:, :context_dim]).astype(weight_dtype)
    w_emb = jnp.transpose(w_ih_p[:, context_dim:]).astype(weight_dtype)
    w_h = jnp.transpose(w_hh_p).astype(weight_dtype)
    b = (b_ih + b_hh)[perm][None, :].astype(jnp.float32)
    return w_ctx, w_emb, w_h, b


def _gate_update(gates, c, H):
    """gates: (B, 4H) f32 in [i|f|o|g] order; c: (B, H) f32 -> (h_t, c_t)."""
    # Full-width nonlinearities blended by a static lane mask — avoids slicing
    # the nonlinearity inputs at sub-vreg boundaries when H < 128.
    lane = jax.lax.broadcasted_iota(jnp.int32, gates.shape, 1)
    act = jnp.where(lane < 3 * H, jax.nn.sigmoid(gates), jnp.tanh(gates))
    i_g = act[:, :H]
    f_g = act[:, H:2 * H]
    o_g = act[:, 2 * H:3 * H]
    g_g = act[:, 3 * H:]
    c_t = f_g * c + i_g * g_g
    h_t = o_g * jnp.tanh(c_t)
    return h_t, c_t


# ---------------------------------------------------------------------------
# Single-step kernel (matches Decoder.forward): three dots against the split
# weights accumulated in f32 — no wrapper-side concat, no HBM round trip.
# ---------------------------------------------------------------------------
def _lstm_step_kernel(ctx_ref, emb_ref, h_ref, c_ref,
                      wc_ref, we_ref, wh_ref, b_ref,
                      h_out_ref, c_out_ref):
    H = c_ref.shape[-1]
    dt = wc_ref.dtype
    gates = (
        jnp.dot(ctx_ref[...].astype(dt), wc_ref[...],
                preferred_element_type=jnp.float32)
        + jnp.dot(emb_ref[...].astype(dt), we_ref[...],
                  preferred_element_type=jnp.float32)
        + jnp.dot(h_ref[...].astype(dt), wh_ref[...],
                  preferred_element_type=jnp.float32)
        + b_ref[...]
    )
    h_t, c_t = _gate_update(gates, c_ref[...].astype(jnp.float32), H)
    h_out_ref[...] = h_t.astype(h_out_ref.dtype)
    c_out_ref[...] = c_t.astype(c_out_ref.dtype)


def decoder_forward(context, word_embedding, states, prepared_params):
    """Pallas equivalent of Decoder.forward(context, word_embedding, states)."""
    if word_embedding.ndim == 1:                       # match unsqueeze(0)
        word_embedding = word_embedding[None, :]

    h0, c0 = states
    w_ctx, w_emb, w_h, b = prepared_params
    B, Dc = context.shape
    De = word_embedding.shape[1]
    H = h0.shape[1]

    full = lambda shape: pl.BlockSpec(shape, lambda: (0,) * len(shape))

    h_t, c_t = pl.pallas_call(
        _lstm_step_kernel,
        out_shape=(
            jax.ShapeDtypeStruct((B, H), h0.dtype),
            jax.ShapeDtypeStruct((B, H), c0.dtype),
        ),
        grid=(),
        in_specs=[
            full((B, Dc)),            # context
            full((B, De)),            # word embedding
            full((B, H)),             # h0
            full((B, H)),             # c0
            full((Dc, 4 * H)),        # W_ctx (bf16)
            full((De, 4 * H)),        # W_emb (bf16)
            full((H, 4 * H)),         # W_h   (bf16)
            full((1, 4 * H)),         # fused f32 bias
        ],
        out_specs=(full((B, H)), full((B, H))),
    )(context, word_embedding, h0, c0, w_ctx, w_emb, w_h, b)
    return h_t, c_t


# ---------------------------------------------------------------------------
# Multi-step rollout kernel: ONE grid step for the whole sequence.
#   Phase 1 (off the serial path): Z = emb_all @ W_emb as one (T*B, De) dot;
#            b_eff = b + ctx @ W_ctx computed once.
#   Phase 2: per-step recurrence is only h @ W_h (+ Z_t + b_eff), h/c carried
#            as f32 loop values, h_seq written to the VMEM-resident output
#            block, final h/c written once after the loop.
# ---------------------------------------------------------------------------
def _lstm_rollout_kernel(ctx_ref, emb_ref, h0_ref, c0_ref,
                         wc_ref, we_ref, wh_ref, b_ref,
                         hseq_ref, hfin_ref, cfin_ref,
                         z_ref):
    B, H = h0_ref.shape
    T = hseq_ref.shape[0]
    dt = wc_ref.dtype

    # ---- Phase 1: non-recurrent input projection, hoisted off the recurrence.
    b_eff = (jnp.dot(ctx_ref[...].astype(dt), wc_ref[...],
                     preferred_element_type=jnp.float32)
             + b_ref[...])                                    # (B, 4H)
    z_ref[...] = jnp.dot(emb_ref[...].astype(dt), we_ref[...],
                         preferred_element_type=jnp.float32)  # (T*B, 4H)

    w_h = wh_ref[...]
    h_init = h0_ref[...].astype(jnp.float32)
    c_init = c0_ref[...].astype(jnp.float32)

    # ---- Phase 2: serial recurrence (per-step dot is just (B,H)@(H,4H)).
    def step(t, carry):
        h, c = carry
        gates = (jnp.dot(h.astype(dt), w_h, preferred_element_type=jnp.float32)
                 + z_ref[pl.ds(t * B, B)]
                 + b_eff)
        h_t, c_t = _gate_update(gates, c, H)
        # Store into the VMEM-resident output block; HBM writeback happens
        # once when the (single) grid step finishes.
        hseq_ref[t] = h_t.astype(hseq_ref.dtype)
        return h_t, c_t

    h_fin, c_fin = jax.lax.fori_loop(0, T, step, (h_init, c_init), unroll=True)
    hfin_ref[...] = h_fin.astype(hfin_ref.dtype)
    cfin_ref[...] = c_fin.astype(cfin_ref.dtype)


def decoder_rollout(context, emb_seq, states, prepared_params):
    """Apply the decoder step for T tokens (emb_seq: (T, B, De)) in one kernel.

    Returns (h_seq, (h_T, c_T)).
    """
    h0, c0 = states
    w_ctx, w_emb, w_h, b = prepared_params
    T, B, De = emb_seq.shape
    Dc = context.shape[1]
    H = h0.shape[1]

    emb_flat = emb_seq.reshape(T * B, De)   # one-time, row-major reshape

    full = lambda shape: pl.BlockSpec(shape, lambda: (0,) * len(shape))

    h_seq, h_fin, c_fin = pl.pallas_call(
        _lstm_rollout_kernel,
        out_shape=(
            jax.ShapeDtypeStruct((T, B, H), h0.dtype),
            jax.ShapeDtypeStruct((B, H), h0.dtype),
            jax.ShapeDtypeStruct((B, H), c0.dtype),
        ),
        grid=(),
        in_specs=[
            full((B, Dc)),            # context (constant across T)
            full((T * B, De)),        # all embeddings, flattened for one dot
            full((B, H)),             # h0
            full((B, H)),             # c0
            full((Dc, 4 * H)),        # W_ctx
            full((De, 4 * H)),        # W_emb
            full((H, 4 * H)),         # W_h
            full((1, 4 * H)),         # fused bias
        ],
        out_specs=(
            full((T, B, H)),          # per-token h, written back once
            full((B, H)),             # final h
            full((B, H)),             # final c
        ),
        scratch_shapes=[
            pltpu.VMEM((T * B, 4 * H), jnp.float32),   # precomputed Z
        ],
    )(context, emb_flat, h0, c0, w_ctx, w_emb, w_h, b)
    return h_seq, (h_fin, c_fin)


# ---------------------------------------------------------------------------
# Pure-JAX references.
# ---------------------------------------------------------------------------
def _reference_forward(context, word_embedding, states, params, *, weight_dtype=None):
    """Reference matching torch.nn.LSTMCell semantics.

    With weight_dtype=bf16 the matmul operands are rounded to bf16 (matching
    the kernel's MXU path) while all other math stays float32.
    """
    if word_embedding.ndim == 1:
        word_embedding = word_embedding[None, :]
    h0, c0 = states
    w_ih, w_hh, b_ih, b_hh = params
    h_mm = h0
    if weight_dtype is not None:
        rt = lambda a: a.astype(weight_dtype).astype(jnp.float32)
        w_ih, w_hh = rt(w_ih), rt(w_hh)
        context, word_embedding, h_mm = rt(context), rt(word_embedding), rt(h0)
    x = jnp.concatenate([context, word_embedding], axis=1)
    gates = x @ w_ih.T + b_ih + h_mm @ w_hh.T + b_hh
    i, f, g, o = jnp.split(gates, 4, axis=1)
    i, f, o = jax.nn.sigmoid(i), jax.nn.sigmoid(f), jax.nn.sigmoid(o)
    g = jnp.tanh(g)
    c_t = f * c0 + i * g
    h_t = o * jnp.tanh(c_t)
    return h_t, c_t


if __name__ == "__main__":
    # Small shapes: batch=2, context_dim=16, embed_dim=16 -> input_size=32, hidden=32
    B, Dc, De, H, T = 2, 16, 16, 32, 8
    input_size = Dc + De

    key = jax.random.PRNGKey(0)
    ks = jax.random.split(key, 9)

    bound = 1.0 / math.sqrt(H)
    w_ih = jax.random.uniform(ks[0], (4 * H, input_size), jnp.float32, -bound, bound)
    w_hh = jax.random.uniform(ks[1], (4 * H, H), jnp.float32, -bound, bound)
    b_ih = jax.random.uniform(ks[2], (4 * H,), jnp.float32, -bound, bound)
    b_hh = jax.random.uniform(ks[3], (4 * H,), jnp.float32, -bound, bound)
    params = (w_ih, w_hh, b_ih, b_hh)

    # One-time prep (model-load time), NOT per decode step.
    prepared = prepare_decoder_params(w_ih, w_hh, b_ih, b_hh, Dc)

    context = jax.random.normal(ks[4], (B, Dc), jnp.float32)
    word_embedding = jax.random.normal(ks[5], (B, De), jnp.float32)
    h0 = jax.random.normal(ks[6], (B, H), jnp.float32)
    c0 = jax.random.normal(ks[7], (B, H), jnp.float32)
    emb_seq = jax.random.normal(ks[8], (T, B, De), jnp.float32)

    # References.
    h_ref_bf, c_ref_bf = _reference_forward(
        context, word_embedding, (h0, c0), params, weight_dtype=jnp.bfloat16)
    h_ref_f32, c_ref_f32 = _reference_forward(
        context, word_embedding, (h0, c0), params, weight_dtype=None)

    h_r, c_r = h0, c0
    hseq_ref = []
    for t in range(T):
        h_r, c_r = _reference_forward(
            context, emb_seq[t], (h_r, c_r), params, weight_dtype=jnp.bfloat16)
        hseq_ref.append(h_r)
    hseq_ref = jnp.stack(hseq_ref)
    cfin_ref = c_r
    hfin_ref = h_r

    # Single-step kernel (matches Decoder.forward).
    h_t, c_t = decoder_forward(context, word_embedding, (h0, c0), prepared)
    jax.block_until_ready((h_t, c_t))

    # Multi-step rollout kernel (input projection hoisted off the recurrence).
    h_seq, (h_last, c_fin) = decoder_rollout(context, emb_seq, (h0, c0), prepared)
    jax.block_until_ready((h_seq, h_last, c_fin))

    # Kernel vs matched (bf16-weight) reference: should agree tightly.
    assert jnp.allclose(h_t, h_ref_bf, atol=1e-3), "h_t mismatch (matched precision)"
    assert jnp.allclose(c_t, c_ref_bf, atol=1e-3), "c_t mismatch (matched precision)"
    # Kernel vs full-f32 original semantics: bf16 matmul operands, loose tolerance.
    assert jnp.allclose(h_t, h_ref_f32, atol=5e-2), "h_t drifted from f32 reference"
    assert jnp.allclose(c_t, c_ref_f32, atol=5e-2), "c_t drifted from f32 reference"
    # Rollout kernel vs T repeated matched-reference steps.
    assert jnp.allclose(h_seq, hseq_ref, atol=2e-3), "rollout h mismatch"
    assert jnp.allclose(h_last, hfin_ref, atol=2e-3), "rollout final h mismatch"
    assert jnp.allclose(c_fin, cfin_ref, atol=2e-3), "rollout final c mismatch"

    print("KERNEL_OK")
</pallas_src>

<mosaic_0001>
module attributes {stable_mosaic.version = 11 : i64} {
  func.func @_lstm_step_kernel(%arg0: memref<2x16xf32, #tpu.memory_space<vmem>>, %arg1: memref<2x16xf32, #tpu.memory_space<vmem>>, %arg2: memref<2x32xf32, #tpu.memory_space<vmem>>, %arg3: memref<2x32xf32, #tpu.memory_space<vmem>>, %arg4: memref<16x128xbf16, #tpu.memory_space<vmem>>, %arg5: memref<16x128xbf16, #tpu.memory_space<vmem>>, %arg6: memref<32x128xbf16, #tpu.memory_space<vmem>>, %arg7: memref<1x128xf32, #tpu.memory_space<vmem>>, %arg8: memref<2x32xf32, #tpu.memory_space<vmem>>, %arg9: memref<2x32xf32, #tpu.memory_space<vmem>>) attributes {dimension_semantics = [], scalar_prefetch = 0 : i64, scratch_operands = 0 : i64, tpu.core_type = #tpu.core_type<tc>} {
    %c0 = arith.constant 0 : index
    %c0_0 = arith.constant 0 : index
    %0 = vector.load %arg0[%c0, %c0_0] : memref<2x16xf32, #tpu.memory_space<vmem>>, vector<2x16xf32>
    %1 = arith.truncf %0 : vector<2x16xf32> to vector<2x16xbf16>
    %c0_1 = arith.constant 0 : index
    %c0_2 = arith.constant 0 : index
    %2 = vector.load %arg4[%c0_1, %c0_2] : memref<16x128xbf16, #tpu.memory_space<vmem>>, vector<16x128xbf16>
    %cst = arith.constant dense<0.000000e+00> : vector<2x128xf32>
    %3 = tpu.matmul %1, %2, %cst {dimension_numbers = #tpu.dot_dimension_numbers<[1], [0], [0], [1], [0, 0, 1, 1], [], []>} : vector<2x16xbf16>, vector<16x128xbf16>, vector<2x128xf32> -> vector<2x128xf32>
    %c0_3 = arith.constant 0 : index
    %c0_4 = arith.constant 0 : index
    %4 = vector.load %arg1[%c0_3, %c0_4] : memref<2x16xf32, #tpu.memory_space<vmem>>, vector<2x16xf32>
    %5 = arith.truncf %4 : vector<2x16xf32> to vector<2x16xbf16>
    %c0_5 = arith.constant 0 : index
    %c0_6 = arith.constant 0 : index
    %6 = vector.load %arg5[%c0_5, %c0_6] : memref<16x128xbf16, #tpu.memory_space<vmem>>, vector<16x128xbf16>
    %cst_7 = arith.constant dense<0.000000e+00> : vector<2x128xf32>
    %7 = tpu.matmul %5, %6, %cst_7 {dimension_numbers = #tpu.dot_dimension_numbers<[1], [0], [0], [1], [0, 0, 1, 1], [], []>} : vector<2x16xbf16>, vector<16x128xbf16>, vector<2x128xf32> -> vector<2x128xf32>
    %8 = arith.addf %3, %7 : vector<2x128xf32>
    %c0_8 = arith.constant 0 : index
    %c0_9 = arith.constant 0 : index
    %9 = vector.load %arg2[%c0_8, %c0_9] : memref<2x32xf32, #tpu.memory_space<vmem>>, vector<2x32xf32>
    %10 = arith.truncf %9 : vector<2x32xf32> to vector<2x32xbf16>
    %c0_10 = arith.constant 0 : index
    %c0_11 = arith.constant 0 : index
    %11 = vector.load %arg6[%c0_10, %c0_11] : memref<32x128xbf16, #tpu.memory_space<vmem>>, vector<32x128xbf16>
    %cst_12 = arith.constant dense<0.000000e+00> : vector<2x128xf32>
    %12 = tpu.matmul %10, %11, %cst_12 {dimension_numbers = #tpu.dot_dimension_numbers<[1], [0], [0], [1], [0, 0, 1, 1], [], []>} : vector<2x32xbf16>, vector<32x128xbf16>, vector<2x128xf32> -> vector<2x128xf32>
    %13 = arith.addf %8, %12 : vector<2x128xf32>
    %c0_13 = arith.constant 0 : index
    %c0_14 = arith.constant 0 : index
    %14 = vector.load %arg7[%c0_13, %c0_14] : memref<1x128xf32, #tpu.memory_space<vmem>>, vector<1x128xf32>
    %15 = vector.broadcast %14 : vector<1x128xf32> to vector<2x128xf32>
    %16 = arith.addf %13, %15 : vector<2x128xf32>
    %c0_15 = arith.constant 0 : index
    %c0_16 = arith.constant 0 : index
    %17 = vector.load %arg3[%c0_15, %c0_16] : memref<2x32xf32, #tpu.memory_space<vmem>>, vector<2x32xf32>
    %18 = tpu.iota {dimensions = array<i32: 1>} : vector<2x128xi32>
    %c96_i32 = arith.constant 96 : i32
    %19 = vector.broadcast %c96_i32 : i32 to vector<2x128xi32>
    %20 = arith.cmpi slt, %18, %19 : vector<2x128xi32>
    %21 = arith.negf %16 : vector<2x128xf32>
    %22 = math.exp %21 : vector<2x128xf32>
    %cst_17 = arith.constant 1.000000e+00 : f32
    %23 = vector.broadcast %cst_17 : f32 to vector<2x128xf32>
    %24 = arith.addf %23, %22 : vector<2x128xf32>
    %25 = arith.divf %23, %24 : vector<2x128xf32>
    %26 = math.tanh %16 : vector<2x128xf32>
    %27 = arith.select %20, %25, %26 : vector<2x128xi1>, vector<2x128xf32>
    %28 = vector.extract_strided_slice %27 {offsets = [0, 0], sizes = [2, 32], strides = [1, 1]} : vector<2x128xf32> to vector<2x32xf32>
    %29 = vector.extract_strided_slice %27 {offsets = [0, 32], sizes = [2, 32], strides = [1, 1]} : vector<2x128xf32> to vector<2x32xf32>
    %30 = vector.extract_strided_slice %27 {offsets = [0, 64], sizes = [2, 32], strides = [1, 1]} : vector<2x128xf32> to vector<2x32xf32>
    %31 = vector.extract_strided_slice %27 {offsets = [0, 96], sizes = [2, 32], strides = [1, 1]} : vector<2x128xf32> to vector<2x32xf32>
    %32 = arith.mulf %29, %17 : vector<2x32xf32>
    %33 = arith.mulf %28, %31 : vector<2x32xf32>
    %34 = arith.addf %32, %33 : vector<2x32xf32>
    %35 = math.tanh %34 : vector<2x32xf32>
    %36 = arith.mulf %30, %35 : vector<2x32xf32>
    %c0_18 = arith.constant 0 : index
    %c0_19 = arith.constant 0 : index
    %37 = vector.load %arg8[%c0_18, %c0_19] : memref<2x32xf32, #tpu.memory_space<vmem>>, vector<2x32xf32>
    tpu.vector_store %arg8[%c0_18, %c0_19], %36 {strides = array<i32>} : memref<2x32xf32, #tpu.memory_space<vmem>>, vector<2x32xf32>,
    %c0_20 = arith.constant 0 : index
    %c0_21 = arith.constant 0 : index
    %38 = vector.load %arg9[%c0_20, %c0_21] : memref<2x32xf32, #tpu.memory_space<vmem>>, vector<2x32xf32>
    tpu.vector_store %arg9[%c0_20, %c0_21], %34 {strides = array<i32>} : memref<2x32xf32, #tpu.memory_space<vmem>>, vector<2x32xf32>,
    return
  }
}

</mosaic_0001>

<bundles_post_ra>
// kernel: tpu_custom_call.1
= control target key start
LH: loop header
LB: loop body
LE: loop exit
PB: predicated region body
PF: predicated region fallthrough
CT: control target
= control target key end

     0   :  { %15 = vsyncpa [#allocation3], 0  ;;  %s657_s0 = inlined_call_operand.hbm [shape: f32[2,16], index: 0, kind: input, shape index: {}]   ;;  %s658_s1 = inlined_call_operand.hbm [shape: f32[2,16], index: 1, kind: input, shape index: {}]   ;;  %s659_s2 = inlined_call_operand.hbm [shape: f32[2,32], index: 2, kind: input, shape index: {}]   ;;  %s660_s3 = inlined_call_operand.vmem [shape: f32[2,32], index: 3, kind: input, shape index: {}]   ;;  %s661_s4 = inlined_call_operand.hbm [shape: bf16[16,128], index: 4, kind: input, shape index: {}]   ;;  %s662_s5 = inlined_call_operand.hbm [shape: bf16[16,128], index: 5, kind: input, shape index: {}]   ;;  %s663_s6 = inlined_call_operand.hbm [shape: bf16[32,128], index: 6, kind: input, shape index: {}]   ;;  %s664_s7 = inlined_call_operand.vmem [shape: f32[1,128], index: 7, kind: input, shape index: {}]   ;;  %s665_s8 = inlined_call_operand.hbm [shape: f32[2,32], index: 8, kind: output, shape index: {0}]   ;;  %s666_s9 = inlined_call_operand.hbm [shape: f32[2,32], index: 9, kind: output, shape index: {1}]  }
   0x1   :  { %16 = vsyncpa [#allocation6], 0 }
   0x2   :  { %17 = vsyncpa [#allocation9], 0 }
   0x3   :  { %18 = vsyncpa [#allocation12], 0 }
   0x4   :  { %19 = vsyncpa [#allocation4], 0  ;;  %s37_s11 = sshll.u32 %s658_s1, 4  ;;  %s38_s11 = int_to_ptr.hbm [resolvable:$true] %s37_s11 }
   0x5   :  { %20 = vsyncpa [#allocation15], 0  ;;  %s558_s12 = smov [#allocation5]   ;;  %s60_s16 = sshll.u32 %s661_s4, 4  ;;  %s61_s16 = int_to_ptr.hbm [resolvable:$true] %s60_s16 }
   0x6   :  { %s39_s13 = sshll.u32 %s558_s12, 4  ;;  %s559_s17 = smov [#allocation8]   ;;  %s40_s13 = int_to_ptr.vmem [resolvable:$true] %s39_s13 }
   0x7   :  { %42 = dma.hbm_to_vmem [thread:$0]  %s38_s11, 32, %s40_s13, [#allocation6]  }
   0x8   :  { %s62_s18 = sshll.u32 %s559_s17, 4  ;;  %s560_s19 = smov 64   ;;  %s63_s18 = int_to_ptr.vmem [resolvable:$true] %s62_s18 }
   0x9   :  { %s561_s20 = smov 4   ;;  %s26_s22 = sshll.u32 %s657_s0, 4  ;;  %s27_s22 = int_to_ptr.hbm [resolvable:$true] %s26_s22 }
   0xa   :  { %68 = dma.hbm_to_vmem [thread:$0]  %s61_s16, 128, %s63_s18, [#allocation9], %s560_s19, %s560_s19, %s561_s20  }
   0xb   :  { %s562_s23 = smov [#allocation2]   ;;  %s48_s26 = sshll.u32 %s659_s2, 4  ;;  %s49_s26 = int_to_ptr.hbm [resolvable:$true] %s48_s26 }
   0xc   :  { %s28_s24 = sshll.u32 %s562_s23, 4  ;;  %s563_s27 = smov [#allocation7]   ;;  %s29_s24 = int_to_ptr.vmem [resolvable:$true] %s28_s24 }
   0xd   :  { %31 = dma.hbm_to_vmem [thread:$0]  %s27_s22, 32, %s29_s24, [#allocation3]  }
   0xe   :  { %s50_s28 = sshll.u32 %s563_s27, 4  ;;  %s73_s10 = sshll.u32 %s662_s5, 4  ;;  %s51_s28 = int_to_ptr.vmem [resolvable:$true] %s50_s28  ;;  %s74_s10 = int_to_ptr.hbm [resolvable:$true] %s73_s10 }
   0xf   :  { %53 = dma.hbm_to_vmem [thread:$0]  %s49_s26, 32, %s51_s28, [#allocation6]  }
  0x10   :  { %s86_s12 = sshll.u32 %s663_s6, 4  ;;  %s564_s13 = smov [#allocation10]   ;;  %s87_s12 = int_to_ptr.hbm [resolvable:$true] %s86_s12 }
  0x11   :  { %s75_s14 = sshll.u32 %s564_s13, 4  ;;  %s565_s2 = smov [#allocation11]   ;;  %s76_s14 = int_to_ptr.vmem [resolvable:$true] %s75_s14 }
  0x12   :  { %81 = dma.hbm_to_vmem [thread:$0]  %s74_s10, 128, %s76_s14, [#allocation9], %s560_s19, %s560_s19, %s561_s20  }
  0x13   :  { %s88_s15 = sshll.u32 %s565_s2, 4  ;;  %s89_s15 = int_to_ptr.vmem [resolvable:$true] %s88_s15 }
  0x14   :  { %94 = dma.hbm_to_vmem [thread:$0]  %s87_s12, 256, %s89_s15, [#allocation12], %s560_s19, %s560_s19, %s561_s20  }
  0x15   :  { %546 = dma.done.wait [#allocation3], 32  }
  0x16   :  { %547 = vsyncadd [#allocation3], 4294967264 }
  0x17   :  { %548 = dma.done.wait [#allocation6], 64  }
  0x18   :  { %549 = vsyncadd [#allocation6], 4294967232 }
  0x19   :  { %550 = dma.done.wait [#allocation9], 256  }
  0x1a   :  { %551 = vsyncadd [#allocation9], 4294967040 }
  0x1b   :  { %552 = dma.done.wait [#allocation12], 256  }
  0x1c   :  { %553 = vsyncadd [#allocation12], 4294967040  ;;  %v330_v0 = vld [vmem:[#allocation10] sm:$0xff]  ;;  %v329_v1 = vld [vmem:[#allocation8] sm:$0xff]  ;;  %vm136_vm0 = vcmask 130048   ;;  %vm193_vm1 = vcmask 261120   ;;  %v217_v24 = vlaneseq }
  0x1d   :  { %v332_v2 = vld [vmem:[#allocation11 + $0x8] sm:$0xff]  ;;  %147 = vmatpush.bf16.msra.mxu0 %v330_v0  ;;  %169 = vmatpush.bf16.msra.mxu1 %v329_v1  ;;  %v331_v7 = vld [vmem:[#allocation11] sm:$0xff]  ;;  %s567_s18 = smov 96   ;;  %s568_s20 = smov [#allocation13]   ;;  %vm266_vm7 = vcmask 254976  }
  0x1e   :  { %v126_v3 = vld [vmem:[#allocation5] sm:$0x3]  ;;  %v122_v4 = vld [vmem:[#allocation2] sm:$0x3]  ;;  %203 = vmatpush.bf16.msra.mxu2 %v332_v2  ;;  %v175_v8 = vld [vmem:[#allocation7] sm:$0x3] }
  0x1f   :  { %v127_v5 = vpack.c.bf16 %v126_v3, %v126_v3  ;;  %v123_v6 = vpack.c.bf16 %v122_v4, %v122_v4  ;;  %v176_v9 = vpack.c.bf16 %v175_v8, %v175_v8  ;;  %v345_v15 = vld [vmem:[%s664_s7] ss:$0 sm:$0xff]  ;;  %v218_v27 = vand.u32 127, %v217_v24  ;;  %s566_s7 = smov 32   ;;  %s278_s1 = sshll.u32 %s568_s20, 4  ;;  %s279_s1 = int_to_ptr.vmem [resolvable:$true] %s278_s1 }
  0x20   :  { %v216_v37 = vld [vmem:[%s660_s3] sm:$0x3]  ;;  %s280_s22 = sshll.u32 %s665_s8, 4  ;;  %s569_s23 = smov [#allocation14]   ;;  %s281_s22 = int_to_ptr.hbm [resolvable:$true] %s280_s22 }
  0x21   :  { %313 = vmatmul.msk.bf16.vlgmr.msra.gmra.mxu0 %vm136_vm0, %v127_v5  ;;  %318 = vmatmul.msk.bf16.vlgmr.msra.gmra.mxu1 %vm136_vm0, %v123_v6  ;;  %vm219_vm4 = vcmp.lt.s32.totalorder %v218_v27, 96  ;;  %s289_s24 = sshll.u32 %s569_s23, 4  ;;  %s290_s24 = int_to_ptr.vmem [resolvable:$true] %s289_s24 }
  0x22   :  { %204 = vmatpush.bf16.msra.mxu2 %v331_v7 }
  0x25   :  { %327 = vmatmul.msk.bf16.vlgmr.msra.gmra.mxu2 %vm193_vm1, %v176_v9 }
  0x9e   :  { %v149_v10 = vpop.f32.mrf.mxu0  ;;  %v171_v11 = vpop.f32.mrf.mxu1 }
  0x9f   :  { %v172_v12 = vadd.f32 %v171_v11, %v149_v10 }
  0xa6   :  { %v151_v13 = vpop.f32.mrf.mxu0  ;;  %v173_v14 = vpop.f32.mrf.mxu1 }
  0xa8   :  { %v206_v16 = vpop.f32.mrf.mxu2 }
  0xa9   :  { %v210_v17 = vadd.f32 %v206_v16, %v172_v12 }
  0xab   :  { %v215_v18 = vadd.f32 %v345_v15, %v210_v17 }
  0xad   :  { %v328_v19 = vmul.f32 -1.442695, %v215_v18 }
  0xaf   :  { %346 = vpow2.f32 %v328_v19 }
  0xb0   :  { %v208_v20 = vpop.f32.mrf.mxu2 }
  0xb5   :  { %v347_v21 = vpop.eup %346 }
  0xb6   :  { %v223_v22 = vadd.f32 1.0, %v347_v21 }
  0xb8   :  { %348 = vrcp.f32 %v223_v22  ;;  %v235_v28 = vand.u32 2147483648, %v223_v22  ;;  %v233_v30 = vand.u32 2147483647, %v223_v22  ;;  %vm229_vm3 = vweird.f32 %v223_v22 }
  0xb9   :  { %350 = vtanh.f32 %v215_v18 }
  0xba   :  { %v236_v32 = vor.u32 1.1754944e-38, %v235_v28  ;;  %vm234_vm6 = vcmp.eq.f32.partialorder %v233_v30, 8.507059e+37 }
  0xbe   :  { %v349_v23 = vpop.eup %348 }
  0xbf   :  { %v225_v25 = vmul.f32 %v349_v23, %v223_v22  ;;  %vm230_vm2 = vweird.f32 %v349_v23  ;;  %v351_v34 = vpop.eup %350 }
  0xc0   :  { %vm231_vm5 = vmor %vm229_vm3, %vm230_vm2 }
  0xc1   :  { %v226_v26 = vsub.f32 1.0, %v225_v25 }
  0xc3   :  { %v227_v29 = vmul.f32 %v349_v23, %v226_v26 }
  0xc5   :  { %v228_v31 = vadd.f32 %v349_v23, %v227_v29 }
  0xc7   :  { %v232_v33 = vsel %vm231_vm5, %v349_v23, %v228_v31 }
  0xc8   :  { %v237_v35 = vsel %vm234_vm6, %v236_v32, %v232_v33 }
  0xc9   :  { %v240_v36 = vsel %vm219_vm4, %v237_v35, %v351_v34 }
  0xca   :  { %247 = vrot.lane.b32.xlu0 %v240_v36, %s566_s7 }
  0xd2   :  { %242 = vrot.lane.b32.xlu0 %v216_v37, %s566_s7 }
 0x13c   :  { %v248_v38 = vpop.permute.xlu0 %247 }
 0x13d   :  { %v250_v39 = vmul.f32 %v248_v38, %v240_v36 }
 0x13f   :  { %252 = vrot.lane.b32.xlu1 %v250_v39, %s566_s7 }
 0x144   :  { %v243_v40 = vpop.permute.xlu0 %242 }
 0x145   :  { %v245_v41 = vmul.f32 %v243_v40, %v240_v36 }
 0x1b1   :  { %v253_v42 = vpop.permute.xlu1 %252 }
 0x1b2   :  { %v255_v43 = vadd.f32 %v253_v42, %v245_v41 }
 0x1b4   :  { %352 = vtanh.f32 %v255_v43 }
 0x1ba   :  { %v353_v44 = vpop.eup %352 }
 0x1bb   :  { %258 = vrot.lane.b32.xlu1 %v353_v44, %s566_s7 }
 0x22d   :  { %v259_v45 = vpop.permute.xlu1 %258 }
 0x22e   :  { %v261_v46 = vmul.f32 %v259_v45, %v240_v36 }
 0x230   :  { %263 = vrot.lane.b32.xlu2 %v261_v46, %s560_s19  ;;  %s291_s19 = sshll.u32 %s666_s9, 4  ;;  %s292_s19 = int_to_ptr.hbm [resolvable:$true] %s291_s19 }
 0x238   :  { %269 = vrot.lane.b32.xlu2 %v255_v43, %s567_s18 }
 0x28a   :  { %v264_v47 = vpop.permute.xlu2 %263 }
 0x28b   :  { %267 = vst.msk [vmem:[#allocation13] sm:$0x3] %vm266_vm7, %v264_v47 }
 0x28c   :  { %283 = dma.vmem_to_hbm [thread:$0]  %s279_s1, 32, %s281_s22, [#allocation4]  }
 0x292   :  { %v270_v48 = vpop.permute.xlu2 %269 }
 0x293   :  { %272 = vst.msk [vmem:[#allocation14] sm:$0x3] %vm266_vm7, %v270_v48 }
 0x294   :  { %294 = dma.vmem_to_hbm [thread:$0]  %s290_s24, 32, %s292_s19, [#allocation15]  }
 0x295   :  { %554 = dma.done.wait [#allocation4], 32  }
 0x296   :  { %555 = vsyncadd [#allocation4], 4294967264 }
 0x297   :  { %556 = dma.done.wait [#allocation15], 32  }
 0x298   :  { %557 = vsyncadd [#allocation15], 4294967264 }
 0x299   :  { %303 = vsyncpa [#allocation3], 1 }
 0x29a   :  { %304 = vsyncpa [#allocation6], 1 }
 0x29b   :  { %305 = vsyncpa [#allocation9], 1 }
 0x29c   :  { %306 = vsyncpa [#allocation12], 1 }
 0x29d   :  { %307 = vsyncpa [#allocation4], 1 }
 0x29e   :  { %308 = vsyncpa [#allocation15], 1 }

</bundles_post_ra>
